<compile_context>
chip_gen: v6e
topology: v6e:2x2x1
jax: 0.10.0
libtpu: 0.0.40
codegen_flags: <defaults>
</compile_context>

<pallas_src>
import functools

import jax
import jax.numpy as jnp
from jax.experimental import pallas as pl
from jax.experimental.pallas import tpu as pltpu


def _mish(x):
    # mish(x) = x * tanh(softplus(x)); softplus via logaddexp for stability.
    return x * jnp.tanh(jnp.logaddexp(x, 0.0))


def _critic_kernel(
    s_ref, a_ref,                 # (TB, S), (TB, A) batch tiles
    w1s_ref, w1a_ref, b1_ref,     # (S, 2H), (A, 2H), (1, 2H)
    w2_ref, b2_ref,               # (2, H, H), (2, 1, H)
    w3_ref, b3_ref,               # (2, H, H), (2, 1, H)
    w4_ref, b4_ref,               # (2, 1, H), (1, 2)
    out_ref,                      # (TB, 2)  [q1 | q2]
):
    cd = w1s_ref.dtype            # bf16 fast path or f32 exact path
    hidden = w2_ref.shape[-1]

    # Layer 1, both heads fused along N.  The 'concat' of state/action is
    # realized as two partial matmuls so the wrapper never materializes x.
    h = (
        jnp.dot(s_ref[...].astype(cd), w1s_ref[...],
                preferred_element_type=jnp.float32)
        + jnp.dot(a_ref[...].astype(cd), w1a_ref[...],
                  preferred_element_type=jnp.float32)
        + b1_ref[...]
    )
    h = _mish(h)                                          # (TB, 2H) f32

    q_cols = []
    for head in range(2):                                 # static unroll
        hh = h[:, head * hidden:(head + 1) * hidden]      # (TB, H)
        hh = _mish(
            jnp.dot(hh.astype(cd), w2_ref[head],
                    preferred_element_type=jnp.float32) + b2_ref[head])
        hh = _mish(
            jnp.dot(hh.astype(cd), w3_ref[head],
                    preferred_element_type=jnp.float32) + b3_ref[head])
        # Final Linear(H -> 1): VPU multiply + XLU lane reduction (avoids a
        # degenerate N=1 MXU matmul).
        q_cols.append(jnp.sum(hh * w4_ref[head], axis=-1, keepdims=True))

    out_ref[...] = (jnp.concatenate(q_cols, axis=-1)
                    + b4_ref[...]).astype(out_ref.dtype)


def init_critic_params(key, state_dim, action_dim, hidden_dim=256):
    """PyTorch-style (uniform +/- 1/sqrt(fan_in)) init, per head."""
    in_dim = state_dim + action_dim
    dims = [(in_dim, hidden_dim), (hidden_dim, hidden_dim),
            (hidden_dim, hidden_dim), (hidden_dim, 1)]
    params = []
    for _ in range(2):
        head_params = []
        for fan_in, fan_out in dims:
            key, kw, kb = jax.random.split(key, 3)
            bound = 1.0 / jnp.sqrt(jnp.float32(fan_in))
            w = jax.random.uniform(kw, (fan_in, fan_out), jnp.float32, -bound, bound)
            b = jax.random.uniform(kb, (1, fan_out), jnp.float32, -bound, bound)
            head_params.extend([w, b])
        params.append(tuple(head_params))
    return tuple(params)  # (q1_params, q2_params)


def pack_critic_params(q1_params, q2_params, state_dim,
                       compute_dtype=jnp.bfloat16):
    """Pack per-head PyTorch-layout params into the kernel's fused layout.

    Done once at setup time (not on the forward hot path).  Matmul weights are
    stored in `compute_dtype` (bf16 by default -> native MXU path, half the
    weight DMA); biases and the final row-vector weights stay f32.
    """
    w1_1, b1_1, w2_1, b2_1, w3_1, b3_1, w4_1, b4_1 = q1_params
    w1_2, b1_2, w2_2, b2_2, w3_2, b3_2, w4_2, b4_2 = q2_params
    cd = compute_dtype

    w1 = jnp.concatenate([w1_1, w1_2], axis=1)            # (S+A, 2H)
    w1_s = w1[:state_dim].astype(cd)                      # (S, 2H)
    w1_a = w1[state_dim:].astype(cd)                      # (A, 2H)
    b1 = jnp.concatenate([b1_1, b1_2], axis=1)            # (1, 2H)
    w2 = jnp.stack([w2_1, w2_2]).astype(cd)               # (2, H, H)
    b2 = jnp.stack([b2_1, b2_2])                          # (2, 1, H)
    w3 = jnp.stack([w3_1, w3_2]).astype(cd)               # (2, H, H)
    b3 = jnp.stack([b3_1, b3_2])                          # (2, 1, H)
    w4 = jnp.stack([w4_1.T, w4_2.T])                      # (2, 1, H)
    b4 = jnp.concatenate([b4_1, b4_2], axis=1)            # (1, 2)
    return (w1_s, w1_a, b1, w2, b2, w3, b3, w4, b4)


def _critic_q12(state, action, packed, block_b):
    """Runs the kernel; returns lane-dense (B, 2) slab [q1 | q2]."""
    B, S = state.shape
    A = action.shape[1]

    if B <= block_b:
        tb = B                     # block equals full dim -> always legal
        b_pad = B
    else:
        tb = block_b               # 128: 8-aligned sublanes, good vreg budget
        b_pad = -(-B // tb) * tb
        if b_pad != B:
            state = jnp.pad(state, ((0, b_pad - B), (0, 0)))
            action = jnp.pad(action, ((0, b_pad - B), (0, 0)))

    grid = (b_pad // tb,)

    in_specs = [
        pl.BlockSpec((tb, S), lambda i: (i, 0)),
        pl.BlockSpec((tb, A), lambda i: (i, 0)),
    ]
    # Weights / biases: full-array blocks with a constant index_map -> fetched
    # once and kept resident in VMEM across all batch tiles.
    in_specs += [
        pl.BlockSpec(p.shape, lambda i, _nd=p.ndim: (0,) * _nd) for p in packed
    ]

    out = pl.pallas_call(
        _critic_kernel,
        out_shape=jax.ShapeDtypeStruct((b_pad, 2), jnp.float32),
        grid=grid,
        in_specs=in_specs,
        out_specs=pl.BlockSpec((tb, 2), lambda i: (i, 0)),
        compiler_params=pltpu.CompilerParams(
            dimension_semantics=("parallel",),     # megacore on v7x
            vmem_limit_bytes=32 * 1024 * 1024,
        ),
    )(state, action, *packed)

    return out[:B] if b_pad != B else out


@functools.partial(jax.jit, static_argnames=("block_b",))
def critic_forward(state, action, packed_params, block_b=128):
    q12 = _critic_q12(state, action, packed_params, block_b)
    return q12[:, 0:1], q12[:, 1:2]


@functools.partial(jax.jit, static_argnames=("block_b",))
def critic_q_min(state, action, packed_params, block_b=128):
    # q1/q2 never round-trip to HBM as separate (B,1) tensors; the min is a
    # single tiny reduce over the lane-dense (B, 2) kernel output.
    q12 = _critic_q12(state, action, packed_params, block_b)
    return jnp.min(q12, axis=-1, keepdims=True)


def _reference_forward(state, action, q1_params, q2_params):
    """Pure-JAX f32 reference matching the PyTorch module."""
    x = jnp.concatenate([state, action], axis=-1)

    def head(params):
        w1, b1, w2, b2, w3, b3, w4, b4 = params
        h = _mish(x @ w1 + b1)
        h = _mish(h @ w2 + b2)
        h = _mish(h @ w3 + b3)
        return h @ w4 + b4

    return head(q1_params), head(q2_params)


if __name__ == "__main__":
    # Small but lane-aligned shapes: batch=8, state=16, action=16, hidden=128.
    B, STATE_DIM, ACTION_DIM, HIDDEN = 8, 16, 16, 128

    key = jax.random.PRNGKey(0)
    k_state, k_action, k_params = jax.random.split(key, 3)

    state = jax.random.normal(k_state, (B, STATE_DIM), jnp.float32)
    action = jax.random.normal(k_action, (B, ACTION_DIM), jnp.float32)
    q1_params, q2_params = init_critic_params(k_params, STATE_DIM, ACTION_DIM, HIDDEN)

    r1, r2 = _reference_forward(state, action, q1_params, q2_params)

    # 1) f32-packed path: must match the pure-JAX reference tightly.
    packed_f32 = pack_critic_params(q1_params, q2_params, STATE_DIM,
                                    compute_dtype=jnp.float32)
    q1, q2 = critic_forward(state, action, packed_f32)
    jax.block_until_ready((q1, q2))
    assert q1.shape == (B, 1) and q2.shape == (B, 1)
    assert jnp.allclose(q1, r1, atol=1e-4, rtol=1e-4)
    assert jnp.allclose(q2, r2, atol=1e-4, rtol=1e-4)

    # 2) bf16-weight fast path (default): looser tolerance vs f32 reference.
    packed_bf16 = pack_critic_params(q1_params, q2_params, STATE_DIM)
    q1b, q2b = critic_forward(state, action, packed_bf16)
    qmin = critic_q_min(state, action, packed_bf16)
    jax.block_until_ready((q1b, q2b, qmin))
    assert jnp.allclose(q1b, r1, atol=5e-2, rtol=5e-2)
    assert jnp.allclose(q2b, r2, atol=5e-2, rtol=5e-2)
    assert qmin.shape == (B, 1)
    assert jnp.allclose(qmin, jnp.minimum(r1, r2), atol=5e-2, rtol=5e-2)

    print("KERNEL_OK")
</pallas_src>

<mosaic_0001>
module attributes {stable_mosaic.version = 11 : i64} {
  func.func @_critic_kernel(%arg0: i32, %arg1: memref<8x16xf32, #tpu.memory_space<vmem>>, %arg2: memref<8x16xf32, #tpu.memory_space<vmem>>, %arg3: memref<16x256xf32, #tpu.memory_space<vmem>>, %arg4: memref<16x256xf32, #tpu.memory_space<vmem>>, %arg5: memref<1x256xf32, #tpu.memory_space<vmem>>, %arg6: memref<2x128x128xf32, #tpu.memory_space<vmem>>, %arg7: memref<2x1x128xf32, #tpu.memory_space<vmem>>, %arg8: memref<2x128x128xf32, #tpu.memory_space<vmem>>, %arg9: memref<2x1x128xf32, #tpu.memory_space<vmem>>, %arg10: memref<2x1x128xf32, #tpu.memory_space<vmem>>, %arg11: memref<1x2xf32, #tpu.memory_space<vmem>>, %arg12: memref<8x2xf32, #tpu.memory_space<vmem>>) attributes {dimension_semantics = [#tpu.dimension_semantics<parallel>], iteration_bounds = array<i64: 1>, scalar_prefetch = 0 : i64, scratch_operands = 0 : i64, tpu.core_type = #tpu.core_type<tc>, window_params = [{transform_indices = @transform_0, window_bounds = array<i64: 8, 16>}, {transform_indices = @transform_1, window_bounds = array<i64: 8, 16>}, {pipeline_mode = #tpu.pipeline_mode<synchronous>, transform_indices = @transform_2, window_bounds = array<i64: 16, 256>}, {pipeline_mode = #tpu.pipeline_mode<synchronous>, transform_indices = @transform_3, window_bounds = array<i64: 16, 256>}, {pipeline_mode = #tpu.pipeline_mode<synchronous>, transform_indices = @transform_4, window_bounds = array<i64: 1, 256>}, {pipeline_mode = #tpu.pipeline_mode<synchronous>, transform_indices = @transform_5, window_bounds = array<i64: 2, 128, 128>}, {pipeline_mode = #tpu.pipeline_mode<synchronous>, transform_indices = @transform_6, window_bounds = array<i64: 2, 1, 128>}, {pipeline_mode = #tpu.pipeline_mode<synchronous>, transform_indices = @transform_7, window_bounds = array<i64: 2, 128, 128>}, {pipeline_mode = #tpu.pipeline_mode<synchronous>, transform_indices = @transform_8, window_bounds = array<i64: 2, 1, 128>}, {pipeline_mode = #tpu.pipeline_mode<synchronous>, transform_indices = @transform_9, window_bounds = array<i64: 2, 1, 128>}, {pipeline_mode = #tpu.pipeline_mode<synchronous>, transform_indices = @transform_10, window_bounds = array<i64: 1, 2>}, {transform_indices = @transform_11, window_bounds = array<i64: 8, 2>}]} {
    %c0 = arith.constant 0 : index
    %c0_0 = arith.constant 0 : index
    %0 = vector.load %arg1[%c0, %c0_0] : memref<8x16xf32, #tpu.memory_space<vmem>>, vector<8x16xf32>
    %c0_1 = arith.constant 0 : index
    %c0_2 = arith.constant 0 : index
    %1 = vector.load %arg3[%c0_1, %c0_2] : memref<16x256xf32, #tpu.memory_space<vmem>>, vector<16x256xf32>
    %cst = arith.constant dense<0.000000e+00> : vector<8x256xf32>
    %2 = tpu.matmul %0, %1, %cst {dimension_numbers = #tpu.dot_dimension_numbers<[1], [0], [0], [1], [0, 0, 1, 1], [], []>} : vector<8x16xf32>, vector<16x256xf32>, vector<8x256xf32> -> vector<8x256xf32>
    %c0_3 = arith.constant 0 : index
    %c0_4 = arith.constant 0 : index
    %3 = vector.load %arg2[%c0_3, %c0_4] : memref<8x16xf32, #tpu.memory_space<vmem>>, vector<8x16xf32>
    %c0_5 = arith.constant 0 : index
    %c0_6 = arith.constant 0 : index
    %4 = vector.load %arg4[%c0_5, %c0_6] : memref<16x256xf32, #tpu.memory_space<vmem>>, vector<16x256xf32>
    %cst_7 = arith.constant dense<0.000000e+00> : vector<8x256xf32>
    %5 = tpu.matmul %3, %4, %cst_7 {dimension_numbers = #tpu.dot_dimension_numbers<[1], [0], [0], [1], [0, 0, 1, 1], [], []>} : vector<8x16xf32>, vector<16x256xf32>, vector<8x256xf32> -> vector<8x256xf32>
    %6 = arith.addf %2, %5 : vector<8x256xf32>
    %c0_8 = arith.constant 0 : index
    %c0_9 = arith.constant 0 : index
    %7 = vector.load %arg5[%c0_8, %c0_9] : memref<1x256xf32, #tpu.memory_space<vmem>>, vector<1x256xf32>
    %8 = vector.broadcast %7 : vector<1x256xf32> to vector<8x256xf32>
    %9 = arith.addf %6, %8 : vector<8x256xf32>
    %cst_10 = arith.constant 0.000000e+00 : f32
    %10 = vector.broadcast %cst_10 : f32 to vector<8x256xf32>
    %11 = arith.maximumf %9, %10 : vector<8x256xf32>
    %12 = vector.broadcast %cst_10 : f32 to vector<8x256xf32>
    %13 = arith.subf %9, %12 : vector<8x256xf32>
    %14 = arith.cmpf one, %13, %13 : vector<8x256xf32>
    %15 = vector.broadcast %cst_10 : f32 to vector<8x256xf32>
    %16 = arith.addf %9, %15 : vector<8x256xf32>
    %17 = math.absf %13 : vector<8x256xf32>
    %cst_11 = arith.constant 0.000000e+00 : f32
    %18 = vector.broadcast %cst_11 : f32 to vector<8x256xf32>
    %19 = arith.subf %18, %17 : vector<8x256xf32>
    %20 = math.exp %19 : vector<8x256xf32>
    %21 = math.log1p %20 : vector<8x256xf32>
    %22 = arith.addf %11, %21 : vector<8x256xf32>
    %23 = arith.select %14, %16, %22 : vector<8x256xi1>, vector<8x256xf32>
    %24 = math.tanh %23 : vector<8x256xf32>
    %25 = arith.mulf %9, %24 : vector<8x256xf32>
    %26 = vector.extract_strided_slice %25 {offsets = [0, 0], sizes = [8, 128], strides = [1, 1]} : vector<8x256xf32> to vector<8x128xf32>
    %c0_12 = arith.constant 0 : index
    %c0_13 = arith.constant 0 : index
    %c0_14 = arith.constant 0 : index
    %27 = vector.load %arg6[%c0_12, %c0_13, %c0_14] : memref<2x128x128xf32, #tpu.memory_space<vmem>>, vector<1x128x128xf32>
    %28 = vector.shape_cast %27 : vector<1x128x128xf32> to vector<128x128xf32>
    %cst_15 = arith.constant dense<0.000000e+00> : vector<8x128xf32>
    %29 = tpu.matmul %26, %28, %cst_15 {dimension_numbers = #tpu.dot_dimension_numbers<[1], [0], [0], [1], [0, 0, 1, 1], [], []>} : vector<8x128xf32>, vector<128x128xf32>, vector<8x128xf32> -> vector<8x128xf32>
    %c0_16 = arith.constant 0 : index
    %c0_17 = arith.constant 0 : index
    %c0_18 = arith.constant 0 : index
    %30 = vector.load %arg7[%c0_16, %c0_17, %c0_18] : memref<2x1x128xf32, #tpu.memory_space<vmem>>, vector<1x1x128xf32>
    %31 = vector.shape_cast %30 : vector<1x1x128xf32> to vector<1x128xf32>
    %32 = vector.broadcast %31 : vector<1x128xf32> to vector<8x128xf32>
    %33 = arith.addf %29, %32 : vector<8x128xf32>
    %cst_19 = arith.constant 0.000000e+00 : f32
    %34 = vector.broadcast %cst_19 : f32 to vector<8x128xf32>
    %35 = arith.maximumf %33, %34 : vector<8x128xf32>
    %36 = vector.broadcast %cst_19 : f32 to vector<8x128xf32>
    %37 = arith.subf %33, %36 : vector<8x128xf32>
    %38 = arith.cmpf one, %37, %37 : vector<8x128xf32>
    %39 = vector.broadcast %cst_19 : f32 to vector<8x128xf32>
    %40 = arith.addf %33, %39 : vector<8x128xf32>
    %41 = math.absf %37 : vector<8x128xf32>
    %cst_20 = arith.constant 0.000000e+00 : f32
    %42 = vector.broadcast %cst_20 : f32 to vector<8x128xf32>
    %43 = arith.subf %42, %41 : vector<8x128xf32>
    %44 = math.exp %43 : vector<8x128xf32>
    %45 = math.log1p %44 : vector<8x128xf32>
    %46 = arith.addf %35, %45 : vector<8x128xf32>
    %47 = arith.select %38, %40, %46 : vector<8x128xi1>, vector<8x128xf32>
    %48 = math.tanh %47 : vector<8x128xf32>
    %49 = arith.mulf %33, %48 : vector<8x128xf32>
    %c0_21 = arith.constant 0 : index
    %c0_22 = arith.constant 0 : index
    %c0_23 = arith.constant 0 : index
    %50 = vector.load %arg8[%c0_21, %c0_22, %c0_23] : memref<2x128x128xf32, #tpu.memory_space<vmem>>, vector<1x128x128xf32>
    %51 = vector.shape_cast %50 : vector<1x128x128xf32> to vector<128x128xf32>
    %cst_24 = arith.constant dense<0.000000e+00> : vector<8x128xf32>
    %52 = tpu.matmul %49, %51, %cst_24 {dimension_numbers = #tpu.dot_dimension_numbers<[1], [0], [0], [1], [0, 0, 1, 1], [], []>} : vector<8x128xf32>, vector<128x128xf32>, vector<8x128xf32> -> vector<8x128xf32>
    %c0_25 = arith.constant 0 : index
    %c0_26 = arith.constant 0 : index
    %c0_27 = arith.constant 0 : index
    %53 = vector.load %arg9[%c0_25, %c0_26, %c0_27] : memref<2x1x128xf32, #tpu.memory_space<vmem>>, vector<1x1x128xf32>
    %54 = vector.shape_cast %53 : vector<1x1x128xf32> to vector<1x128xf32>
    %55 = vector.broadcast %54 : vector<1x128xf32> to vector<8x128xf32>
    %56 = arith.addf %52, %55 : vector<8x128xf32>
    %cst_28 = arith.constant 0.000000e+00 : f32
    %57 = vector.broadcast %cst_28 : f32 to vector<8x128xf32>
    %58 = arith.maximumf %56, %57 : vector<8x128xf32>
    %59 = vector.broadcast %cst_28 : f32 to vector<8x128xf32>
    %60 = arith.subf %56, %59 : vector<8x128xf32>
    %61 = arith.cmpf one, %60, %60 : vector<8x128xf32>
    %62 = vector.broadcast %cst_28 : f32 to vector<8x128xf32>
    %63 = arith.addf %56, %62 : vector<8x128xf32>
    %64 = math.absf %60 : vector<8x128xf32>
    %cst_29 = arith.constant 0.000000e+00 : f32
    %65 = vector.broadcast %cst_29 : f32 to vector<8x128xf32>
    %66 = arith.subf %65, %64 : vector<8x128xf32>
    %67 = math.exp %66 : vector<8x128xf32>
    %68 = math.log1p %67 : vector<8x128xf32>
    %69 = arith.addf %58, %68 : vector<8x128xf32>
    %70 = arith.select %61, %63, %69 : vector<8x128xi1>, vector<8x128xf32>
    %71 = math.tanh %70 : vector<8x128xf32>
    %72 = arith.mulf %56, %71 : vector<8x128xf32>
    %c0_30 = arith.constant 0 : index
    %c0_31 = arith.constant 0 : index
    %c0_32 = arith.constant 0 : index
    %73 = vector.load %arg10[%c0_30, %c0_31, %c0_32] : memref<2x1x128xf32, #tpu.memory_space<vmem>>, vector<1x1x128xf32>
    %74 = vector.shape_cast %73 : vector<1x1x128xf32> to vector<1x128xf32>
    %75 = vector.broadcast %74 : vector<1x128xf32> to vector<8x128xf32>
    %76 = arith.mulf %72, %75 : vector<8x128xf32>
    %cst_33 = arith.constant dense<0.000000e+00> : vector<8xf32>
    %77 = vector.multi_reduction <add>, %76, %cst_33 [1] : vector<8x128xf32> to vector<8xf32>
    %78 = vector.shape_cast %77 : vector<8xf32> to vector<8x1xf32>
    %79 = vector.extract_strided_slice %25 {offsets = [0, 128], sizes = [8, 128], strides = [1, 1]} : vector<8x256xf32> to vector<8x128xf32>
    %c1 = arith.constant 1 : index
    %c0_34 = arith.constant 0 : index
    %c0_35 = arith.constant 0 : index
    %80 = vector.load %arg6[%c1, %c0_34, %c0_35] : memref<2x128x128xf32, #tpu.memory_space<vmem>>, vector<1x128x128xf32>
    %81 = vector.shape_cast %80 : vector<1x128x128xf32> to vector<128x128xf32>
    %cst_36 = arith.constant dense<0.000000e+00> : vector<8x128xf32>
    %82 = tpu.matmul %79, %81, %cst_36 {dimension_numbers = #tpu.dot_dimension_numbers<[1], [0], [0], [1], [0, 0, 1, 1], [], []>} : vector<8x128xf32>, vector<128x128xf32>, vector<8x128xf32> -> vector<8x128xf32>
    %c1_37 = arith.constant 1 : index
    %c0_38 = arith.constant 0 : index
    %c0_39 = arith.constant 0 : index
    %83 = vector.load %arg7[%c1_37, %c0_38, %c0_39] : memref<2x1x128xf32, #tpu.memory_space<vmem>>, vector<1x1x128xf32>
    %84 = vector.shape_cast %83 : vector<1x1x128xf32> to vector<1x128xf32>
    %85 = vector.broadcast %84 : vector<1x128xf32> to vector<8x128xf32>
    %86 = arith.addf %82, %85 : vector<8x128xf32>
    %cst_40 = arith.constant 0.000000e+00 : f32
    %87 = vector.broadcast %cst_40 : f32 to vector<8x128xf32>
    %88 = arith.maximumf %86, %87 : vector<8x128xf32>
    %89 = vector.broadcast %cst_40 : f32 to vector<8x128xf32>
    %90 = arith.subf %86, %89 : vector<8x128xf32>
    %91 = arith.cmpf one, %90, %90 : vector<8x128xf32>
    %92 = vector.broadcast %cst_40 : f32 to vector<8x128xf32>
    %93 = arith.addf %86, %92 : vector<8x128xf32>
    %94 = math.absf %90 : vector<8x128xf32>
    %cst_41 = arith.constant 0.000000e+00 : f32
    %95 = vector.broadcast %cst_41 : f32 to vector<8x128xf32>
    %96 = arith.subf %95, %94 : vector<8x128xf32>
    %97 = math.exp %96 : vector<8x128xf32>
    %98 = math.log1p %97 : vector<8x128xf32>
    %99 = arith.addf %88, %98 : vector<8x128xf32>
    %100 = arith.select %91, %93, %99 : vector<8x128xi1>, vector<8x128xf32>
    %101 = math.tanh %100 : vector<8x128xf32>
    %102 = arith.mulf %86, %101 : vector<8x128xf32>
    %c1_42 = arith.constant 1 : index
    %c0_43 = arith.constant 0 : index
    %c0_44 = arith.constant 0 : index
    %103 = vector.load %arg8[%c1_42, %c0_43, %c0_44] : memref<2x128x128xf32, #tpu.memory_space<vmem>>, vector<1x128x128xf32>
    %104 = vector.shape_cast %103 : vector<1x128x128xf32> to vector<128x128xf32>
    %cst_45 = arith.constant dense<0.000000e+00> : vector<8x128xf32>
    %105 = tpu.matmul %102, %104, %cst_45 {dimension_numbers = #tpu.dot_dimension_numbers<[1], [0], [0], [1], [0, 0, 1, 1], [], []>} : vector<8x128xf32>, vector<128x128xf32>, vector<8x128xf32> -> vector<8x128xf32>
    %c1_46 = arith.constant 1 : index
    %c0_47 = arith.constant 0 : index
    %c0_48 = arith.constant 0 : index
    %106 = vector.load %arg9[%c1_46, %c0_47, %c0_48] : memref<2x1x128xf32, #tpu.memory_space<vmem>>, vector<1x1x128xf32>
    %107 = vector.shape_cast %106 : vector<1x1x128xf32> to vector<1x128xf32>
    %108 = vector.broadcast %107 : vector<1x128xf32> to vector<8x128xf32>
    %109 = arith.addf %105, %108 : vector<8x128xf32>
    %cst_49 = arith.constant 0.000000e+00 : f32
    %110 = vector.broadcast %cst_49 : f32 to vector<8x128xf32>
    %111 = arith.maximumf %109, %110 : vector<8x128xf32>
    %112 = vector.broadcast %cst_49 : f32 to vector<8x128xf32>
    %113 = arith.subf %109, %112 : vector<8x128xf32>
    %114 = arith.cmpf one, %113, %113 : vector<8x128xf32>
    %115 = vector.broadcast %cst_49 : f32 to vector<8x128xf32>
    %116 = arith.addf %109, %115 : vector<8x128xf32>
    %117 = math.absf %113 : vector<8x128xf32>
    %cst_50 = arith.constant 0.000000e+00 : f32
    %118 = vector.broadcast %cst_50 : f32 to vector<8x128xf32>
    %119 = arith.subf %118, %117 : vector<8x128xf32>
    %120 = math.exp %119 : vector<8x128xf32>
    %121 = math.log1p %120 : vector<8x128xf32>
    %122 = arith.addf %111, %121 : vector<8x128xf32>
    %123 = arith.select %114, %116, %122 : vector<8x128xi1>, vector<8x128xf32>
    %124 = math.tanh %123 : vector<8x128xf32>
    %125 = arith.mulf %109, %124 : vector<8x128xf32>
    %c1_51 = arith.constant 1 : index
    %c0_52 = arith.constant 0 : index
    %c0_53 = arith.constant 0 : index
    %126 = vector.load %arg10[%c1_51, %c0_52, %c0_53] : memref<2x1x128xf32, #tpu.memory_space<vmem>>, vector<1x1x128xf32>
    %127 = vector.shape_cast %126 : vector<1x1x128xf32> to vector<1x128xf32>
    %128 = vector.broadcast %127 : vector<1x128xf32> to vector<8x128xf32>
    %129 = arith.mulf %125, %128 : vector<8x128xf32>
    %cst_54 = arith.constant dense<0.000000e+00> : vector<8xf32>
    %130 = vector.multi_reduction <add>, %129, %cst_54 [1] : vector<8x128xf32> to vector<8xf32>
    %131 = vector.shape_cast %130 : vector<8xf32> to vector<8x1xf32>
    %132 = tpu.concatenate %78, %131 in 1 : vector<8x1xf32>, vector<8x1xf32> -> vector<8x2xf32>
    %c0_55 = arith.constant 0 : index
    %c0_56 = arith.constant 0 : index
    %133 = vector.load %arg11[%c0_55, %c0_56] : memref<1x2xf32, #tpu.memory_space<vmem>>, vector<1x2xf32>
    %134 = vector.broadcast %133 : vector<1x2xf32> to vector<8x2xf32>
    %135 = arith.addf %132, %134 : vector<8x2xf32>
    %c0_57 = arith.constant 0 : index
    %c0_58 = arith.constant 0 : index
    %136 = vector.load %arg12[%c0_57, %c0_58] : memref<8x2xf32, #tpu.memory_space<vmem>>, vector<8x2xf32>
    tpu.vector_store %arg12[%c0_57, %c0_58], %135 {strides = array<i32>} : memref<8x2xf32, #tpu.memory_space<vmem>>, vector<8x2xf32>,
    return
  }
  func.func @transform_0(%arg0: i32) -> (i32, i32) {
    %c0_i32 = arith.constant 0 : i32
    %c0_i32_0 = arith.constant 0 : i32
    return %arg0, %c0_i32 : i32, i32
  }
  func.func @transform_1(%arg0: i32) -> (i32, i32) {
    %c0_i32 = arith.constant 0 : i32
    %c0_i32_0 = arith.constant 0 : i32
    return %arg0, %c0_i32 : i32, i32
  }
  func.func @transform_2(%arg0: i32) -> (i32, i32) {
    %c0_i32 = arith.constant 0 : i32
    %c0_i32_0 = arith.constant 0 : i32
    %c0_i32_1 = arith.constant 0 : i32
    return %c0_i32, %c0_i32_0 : i32, i32
  }
  func.func @transform_3(%arg0: i32) -> (i32, i32) {
    %c0_i32 = arith.constant 0 : i32
    %c0_i32_0 = arith.constant 0 : i32
    %c0_i32_1 = arith.constant 0 : i32
    return %c0_i32, %c0_i32_0 : i32, i32
  }
  func.func @transform_4(%arg0: i32) -> (i32, i32) {
    %c0_i32 = arith.constant 0 : i32
    %c0_i32_0 = arith.constant 0 : i32
    %c0_i32_1 = arith.constant 0 : i32
    return %c0_i32, %c0_i32_0 : i32, i32
  }
  func.func @transform_5(%arg0: i32) -> (i32, i32, i32) {
    %c0_i32 = arith.constant 0 : i32
    %c0_i32_0 = arith.constant 0 : i32
    %c0_i32_1 = arith.constant 0 : i32
    %c0_i32_2 = arith.constant 0 : i32
    return %c0_i32, %c0_i32_0, %c0_i32_1 : i32, i32, i32
  }
  func.func @transform_6(%arg0: i32) -> (i32, i32, i32) {
    %c0_i32 = arith.constant 0 : i32
    %c0_i32_0 = arith.constant 0 : i32
    %c0_i32_1 = arith.constant 0 : i32
    %c0_i32_2 = arith.constant 0 : i32
    return %c0_i32, %c0_i32_0, %c0_i32_1 : i32, i32, i32
  }
  func.func @transform_7(%arg0: i32) -> (i32, i32, i32) {
    %c0_i32 = arith.constant 0 : i32
    %c0_i32_0 = arith.constant 0 : i32
    %c0_i32_1 = arith.constant 0 : i32
    %c0_i32_2 = arith.constant 0 : i32
    return %c0_i32, %c0_i32_0, %c0_i32_1 : i32, i32, i32
  }
  func.func @transform_8(%arg0: i32) -> (i32, i32, i32) {
    %c0_i32 = arith.constant 0 : i32
    %c0_i32_0 = arith.constant 0 : i32
    %c0_i32_1 = arith.constant 0 : i32
    %c0_i32_2 = arith.constant 0 : i32
    return %c0_i32, %c0_i32_0, %c0_i32_1 : i32, i32, i32
  }
  func.func @transform_9(%arg0: i32) -> (i32, i32, i32) {
    %c0_i32 = arith.constant 0 : i32
    %c0_i32_0 = arith.constant 0 : i32
    %c0_i32_1 = arith.constant 0 : i32
    %c0_i32_2 = arith.constant 0 : i32
    return %c0_i32, %c0_i32_0, %c0_i32_1 : i32, i32, i32
  }
  func.func @transform_10(%arg0: i32) -> (i32, i32) {
    %c0_i32 = arith.constant 0 : i32
    %c0_i32_0 = arith.constant 0 : i32
    %c0_i32_1 = arith.constant 0 : i32
    return %c0_i32, %c0_i32_0 : i32, i32
  }
  func.func @transform_11(%arg0: i32) -> (i32, i32) {
    %c0_i32 = arith.constant 0 : i32
    %c0_i32_0 = arith.constant 0 : i32
    return %arg0, %c0_i32 : i32, i32
  }
}

</mosaic_0001>

<bundles_post_ra>
// kernel: critic_forward.1
= control target key start
LH: loop header
LB: loop body
LE: loop exit
PB: predicated region body
PF: predicated region fallthrough
CT: control target
= control target key end

     0   :  { %16 = vsyncpa [#allocation3], 0  ;;  %s1429_s0 = inlined_call_operand.hbm [shape: f32[8,16], index: 0, kind: input, shape index: {}]   ;;  %s1430_s1 = inlined_call_operand.hbm [shape: f32[8,16], index: 1, kind: input, shape index: {}]   ;;  %s1431_s2 = inlined_call_operand.hbm [shape: f32[16,256], index: 2, kind: input, shape index: {}]   ;;  %s1432_s3 = inlined_call_operand.hbm [shape: f32[16,256], index: 3, kind: input, shape index: {}]   ;;  %s1433_s4 = inlined_call_operand.vmem [shape: f32[1,256], index: 4, kind: input, shape index: {}]   ;;  %s1434_s5 = inlined_call_operand.hbm [shape: f32[2,128,128], index: 5, kind: input, shape index: {}]   ;;  %s1435_s6 = inlined_call_operand.vmem [shape: f32[2,1,128], index: 6, kind: input, shape index: {}]   ;;  %s1436_s7 = inlined_call_operand.hbm [shape: f32[2,128,128], index: 7, kind: input, shape index: {}]   ;;  %s1437_s8 = inlined_call_operand.vmem [shape: f32[2,1,128], index: 8, kind: input, shape index: {}]   ;;  %s1438_s9 = inlined_call_operand.vmem [shape: f32[2,1,128], index: 9, kind: input, shape index: {}]   ;;  %s1439_s10 = inlined_call_operand.vmem [shape: f32[1,2], index: 10, kind: input, shape index: {}]   ;;  %s1440_s11 = inlined_call_operand.vmem [shape: f32[8,2], index: 11, kind: output, shape index: {}]  }
   0x1   :  { %17 = vsyncpa [#allocation5], 0 }
   0x2   :  { %18 = vsyncpa [#allocation8], 0 }
   0x3   :  { %19 = vsyncpa [#allocation11], 0  ;;  %s1222_s17 = smov [#allocation4]  }
   0x4   :  { %s36_s18 = sshll.u32 %s1222_s17, 4  ;;  %s37_s18 = int_to_ptr.vmem [resolvable:$true] %s36_s18 }
   0x5   :  { %s1102_s19 = scalar_lea.vmem %s37_s18, 128  ;;  %p1107_p1 = scmp.lt.s32.totalorder %s37_s18, %s37_s18 }
   0x6   :  { %p1103_p0 = scmp.ne.s32.totalorder %s37_s18, %s1102_s19  ;;  %p1108_p2 = scmp.lt.s32.totalorder %s1102_s19, %s1102_s19 }
   0x8   :  { %p1109_p3 = por %p1108_p2, %p1107_p1 }
   0xa   :  { %p1110_p4 = pnand %p1109_p3, %p1103_p0 }
   0xc   :  { %1113 = shalt.err (!%p1110_p4)
}
   0xd   :  { %39 = dma.hbm_to_vmem [thread:$0]  %s1430_s1, 128, %s37_s18, [#allocation5]  }
   0xe   :  { %s1223_s22 = smov [#allocation7]   ;;  %s1224_s24 = smov [#allocation2]  }
   0xf   :  { %s57_s23 = sshll.u32 %s1223_s22, 4  ;;  %s26_s25 = sshll.u32 %s1224_s24, 4  ;;  %s58_s23 = int_to_ptr.vmem [resolvable:$true] %s57_s23  ;;  %s27_s25 = int_to_ptr.vmem [resolvable:$true] %s26_s25 }
  0x10   :  { %s1122_s26 = scalar_lea.vmem %s58_s23, 512  ;;  %p1127_p6 = scmp.lt.s32.totalorder %s58_s23, %s58_s23 }
  0x11   :  { %p1123_p5 = scmp.ne.s32.totalorder %s58_s23, %s1122_s26  ;;  %p1128_p7 = scmp.lt.s32.totalorder %s1122_s26, %s1122_s26 }
  0x13   :  { %p1129_p8 = por %p1128_p7, %p1127_p6 }
  0x15   :  { %p1130_p9 = pnand %p1129_p8, %p1123_p5 }
  0x17   :  { %1133 = shalt.err (!%p1130_p9)
}
  0x18   :  { %s1225_s27 = smov 256   ;;  %s1226_s28 = smov 16  }
  0x19   :  { %63 = dma.hbm_to_vmem [thread:$0]  %s1432_s3, 512, %s58_s23, [#allocation8], %s1225_s27, %s1225_s27, %s1226_s28  }
  0x1a   :  { %s1142_s1 = scalar_lea.vmem %s27_s25, 128  ;;  %p1147_p11 = scmp.lt.s32.totalorder %s27_s25, %s27_s25 }
  0x1b   :  { %p1143_p10 = scmp.ne.s32.totalorder %s27_s25, %s1142_s1  ;;  %p1148_p12 = scmp.lt.s32.totalorder %s1142_s1, %s1142_s1 }
  0x1d   :  { %p1149_p13 = por %p1148_p12, %p1147_p11 }
  0x1f   :  { %p1150_p0 = pnand %p1149_p13, %p1143_p10 }
  0x21   :  { %1153 = shalt.err (!%p1150_p0)
}
  0x22   :  { %29 = dma.hbm_to_vmem [thread:$0]  %s1429_s0, 128, %s27_s25, [#allocation3]  }
  0x23   :  { %s1227_s14 = smov [#allocation6]   ;;  %s1228_s16 = smov [#allocation9]  }
  0x24   :  { %s45_s15 = sshll.u32 %s1227_s14, 4  ;;  %s71_s17 = sshll.u32 %s1228_s16, 4  ;;  %s46_s15 = int_to_ptr.vmem [resolvable:$true] %s45_s15  ;;  %s72_s17 = int_to_ptr.vmem [resolvable:$true] %s71_s17 }
  0x25   :  { %s1162_s18 = scalar_lea.vmem %s46_s15, 512  ;;  %p1167_p2 = scmp.lt.s32.totalorder %s46_s15, %s46_s15 }
  0x26   :  { %p1163_p1 = scmp.ne.s32.totalorder %s46_s15, %s1162_s18  ;;  %p1168_p3 = scmp.lt.s32.totalorder %s1162_s18, %s1162_s18 }
  0x28   :  { %p1169_p4 = por %p1168_p3, %p1167_p2 }
  0x2a   :  { %p1170_p5 = pnand %p1169_p4, %p1163_p1 }
  0x2c   :  { %1173 = shalt.err (!%p1170_p5)
}
  0x2d   :  { %51 = dma.hbm_to_vmem [thread:$0]  %s1431_s2, 512, %s46_s15, [#allocation5], %s1225_s27, %s1225_s27, %s1226_s28  }
  0x2e   :  { %s1182_s20 = scalar_lea.vmem %s72_s17, 4096  ;;  %p1187_p7 = scmp.lt.s32.totalorder %s72_s17, %s72_s17 }
  0x2f   :  { %p1183_p6 = scmp.ne.s32.totalorder %s72_s17, %s1182_s20  ;;  %p1188_p8 = scmp.lt.s32.totalorder %s1182_s20, %s1182_s20 }
  0x31   :  { %p1189_p9 = por %p1188_p8, %p1187_p7 }
  0x33   :  { %p1190_p10 = pnand %p1189_p9, %p1183_p6 }
  0x35   :  { %1193 = shalt.err (!%p1190_p10)
}
  0x36   :  { %s1229_s0 = smov 128   ;;  %s1230_s21 = smov 8  }
  0x37   :  { %77 = dma.hbm_to_vmem [thread:$0]  %s1434_s5, 4096, %s72_s17, [#allocation8], %s1229_s0, %s1229_s0, %s1230_s21  }
  0x38   :  { %s1231_s24 = smov [#allocation10]  }
  0x39   :  { %s85_s25 = sshll.u32 %s1231_s24, 4  ;;  %s86_s25 = int_to_ptr.vmem [resolvable:$true] %s85_s25 }
  0x3a   :  { %s1202_s26 = scalar_lea.vmem %s86_s25, 4096  ;;  %p1207_p12 = scmp.lt.s32.totalorder %s86_s25, %s86_s25 }
  0x3b   :  { %p1203_p11 = scmp.ne.s32.totalorder %s86_s25, %s1202_s26  ;;  %p1208_p13 = scmp.lt.s32.totalorder %s1202_s26, %s1202_s26 }
  0x3d   :  { %p1209_p0 = por %p1208_p13, %p1207_p12 }
  0x3f   :  { %p1210_p1 = pnand %p1209_p0, %p1203_p11 }
  0x41   :  { %1213 = shalt.err (!%p1210_p1)
}
  0x42   :  { %91 = dma.hbm_to_vmem [thread:$0]  %s1436_s7, 4096, %s86_s25, [#allocation11], %s1229_s0, %s1229_s0, %s1230_s21  }
  0x43   :  { %1214 = dma.done.wait [#allocation3], 128  }
  0x44   :  { %1215 = vsyncadd [#allocation3], 4294967168 }
  0x45   :  { %1216 = dma.done.wait [#allocation5], 640  }
  0x46   :  { %1217 = vsyncadd [#allocation5], 4294966656 }
  0x47   :  { %1218 = dma.done.wait [#allocation8], 4608  }
  0x48   :  { %1219 = vsyncadd [#allocation8], 4294962688 }
  0x49   :  { %1220 = dma.done.wait [#allocation11], 4096  }
  0x4a   :  { %1221 = vsyncadd [#allocation11], 4294963200  ;;  %v1232_v0 = vmov 0.0   ;;  %v125_v1 = vld [vmem:[#allocation7 + $0x18] sm:$0xff]  ;;  %v124_v3 = vld [vmem:[#allocation7 + $0x10] sm:$0xff]  ;;  %vm126_vm0 = vcmask 130048   ;;  %v277_v27 = vlaneseq }
  0x4b   :  { %194 = vmatprep.mubr.f32.mxu0 %v1232_v0  ;;  %268 = vmatprep.mubr.f32.mxu1 %v1232_v0  ;;  %v120_v2 = vld [vmem:[#allocation6 + $0x18] sm:$0xff]  ;;  %v119_v4 = vld [vmem:[#allocation6 + $0x10] sm:$0xff]  ;;  %v123_v5 = vld [vmem:[#allocation7 + $0x8] sm:$0xff]  ;;  %vm1233_vm1 = vmmov 0   ;;  %vm806_vm14 = vcmask 7168   ;;  %vm816_vm15 = vcmask 15360  }
  0x4c   :  { %158 = vmatprep.subr.mxu0 %v125_v1  ;;  %232 = vmatprep.subr.mxu1 %v120_v2  ;;  %v118_v6 = vld [vmem:[#allocation6 + $0x8] sm:$0xff]  ;;  %v122_v7 = vld [vmem:[#allocation7] sm:$0xff]  ;;  %v121_v9 = vld [vmem:[#allocation4] sm:$0xff]  ;;  %v278_v28 = vshrl.u32 %v277_v27, 7 }
  0x4d   :  { %159 = vmatpush1.msra.mxu0 %v124_v3  ;;  %233 = vmatpush1.msra.mxu1 %v119_v4  ;;  %v117_v8 = vld [vmem:[#allocation6] sm:$0xff]  ;;  %v116_v10 = vld [vmem:[#allocation2] sm:$0xff]  ;;  %v344_v11 = vld [vmem:[#allocation9 + $0x78] sm:$0xff] }
  0x4e   :  { %160 = vmatprep.subr.mxu0 %v123_v5  ;;  %234 = vmatprep.subr.mxu1 %v118_v6  ;;  %v343_v12 = vld [vmem:[#allocation9 + $0x70] sm:$0xff]  ;;  %v342_v13 = vld [vmem:[#allocation9 + $0x68] sm:$0xff]  ;;  %v341_v14 = vld [vmem:[#allocation9 + $0x60] sm:$0xff]  ;;  %v279_v29 = vsub.s32 0, %v278_v28  ;;  %v283_v35 = vsub.s32 1, %v278_v28 }
  0x4f   :  { %161 = vmatpush1.msra.mxu0 %v122_v7  ;;  %235 = vmatpush1.msra.mxu1 %v117_v8  ;;  %v340_v15 = vld [vmem:[#allocation9 + $0x58] sm:$0xff]  ;;  %v339_v16 = vld [vmem:[#allocation9 + $0x50] sm:$0xff]  ;;  %v338_v17 = vld [vmem:[#allocation9 + $0x48] sm:$0xff] }
  0x50   :  { %826 = vmatmul.mubr.msk.f32.vlgmr.msra.gmra.mxu0 %vm126_vm0, %v121_v9  ;;  %827 = vmatmul.mubr.msk.f32.vlgmr.msra.gmra.mxu1 %vm126_vm0, %v116_v10  ;;  %v337_v18 = vld [vmem:[#allocation9 + $0x40] sm:$0xff]  ;;  %v336_v19 = vld [vmem:[#allocation9 + $0x38] sm:$0xff]  ;;  %v335_v20 = vld [vmem:[#allocation9 + $0x30] sm:$0xff] }
  0x51   :  { %906 = vmatprep.subr.mxu0 %v1232_v0  ;;  %941 = vmatprep.subr.mxu1 %v1232_v0  ;;  %v334_v21 = vld [vmem:[#allocation9 + $0x28] sm:$0xff]  ;;  %v333_v22 = vld [vmem:[#allocation9 + $0x20] sm:$0xff]  ;;  %v332_v23 = vld [vmem:[#allocation9 + $0x18] sm:$0xff] }
  0x52   :  { %907 = vmatpush3.msra.mxu0 %v344_v11  ;;  %938 = vmatprep.mubr.msk.f32.mxu0 %vm1233_vm1, %v1232_v0  ;;  %v331_v24 = vld [vmem:[#allocation9 + $0x10] sm:$0xff]  ;;  %v330_v25 = vld [vmem:[#allocation9 + $0x8] sm:$0xff]  ;;  %v329_v26 = vld [vmem:[#allocation9] sm:$0xff] }
  0x53   :  { %908 = vmatprep.subr.mxu0 %v1232_v0  ;;  %973 = vmatprep.mubr.msk.f32.mxu1 %vm1233_vm1, %v1232_v0  ;;  %v275_v30 = vld [vmem:[%s1433_s4] sm:$0x3]  ;;  %v581_v4 = vld [vmem:[#allocation9 + $0xf8] sm:$0xff]  ;;  %v579_v9 = vld [vmem:[#allocation9 + $0xe8] sm:$0xff] }
  0x54   :  { %909 = vmatpush3.msra.mxu0 %v343_v12  ;;  %v280_v31 = vrot.slane %v275_v30, %v279_v29  ;;  %v284_v41 = vrot.slane %v275_v30, %v283_v35  ;;  %v580_v7 = vld [vmem:[#allocation9 + $0xf0] sm:$0xff]  ;;  %v578_v11 = vld [vmem:[#allocation9 + $0xe0] sm:$0xff]  ;;  %v457_v29 = vld [vmem:[#allocation10 + $0x78] sm:$0xff] }
  0x55   :  { %910 = vmatprep.subr.mxu0 %v1232_v0  ;;  %v566_v27 = vld [vmem:[#allocation9 + $0x80] sm:$0xff]  ;;  %942 = vmatpush3.msra.mxu1 %v457_v29  ;;  %v456_v30 = vld [vmem:[#allocation10 + $0x70] sm:$0xff]  ;;  %v451_v35 = vld [vmem:[#allocation10 + $0x48] sm:$0xff] }
  0x56   :  { %911 = vmatpush3.msra.mxu0 %v342_v13  ;;  %v577_v13 = vld [vmem:[#allocation9 + $0xd8] sm:$0xff]  ;;  %943 = vmatprep.subr.mxu1 %v1232_v0 }
  0x57   :  { %912 = vmatprep.subr.mxu0 %v1232_v0  ;;  %944 = vmatpush3.msra.mxu1 %v456_v30  ;;  %v688_v29 = vld [vmem:[#allocation10 + $0xb8] sm:$0xff] }
  0x58   :  { %913 = vmatpush3.msra.mxu0 %v341_v14  ;;  %945 = vmatprep.subr.mxu1 %v1232_v0 }
  0x59   :  { %914 = vmatprep.subr.mxu0 %v1232_v0 }
  0x5a   :  { %915 = vmatpush3.msra.mxu0 %v340_v15  ;;  %v576_v15 = vld [vmem:[#allocation9 + $0xd0] sm:$0xff] }
  0x5b   :  { %916 = vmatprep.subr.mxu0 %v1232_v0 }
  0x5c   :  { %917 = vmatpush3.msra.mxu0 %v339_v16  ;;  %v575_v16 = vld [vmem:[#allocation9 + $0xc8] sm:$0xff] }
  0x5d   :  { %918 = vmatprep.subr.mxu0 %v1232_v0 }
  0x5e   :  { %919 = vmatpush3.msra.mxu0 %v338_v17 }
  0x5f   :  { %920 = vmatprep.subr.mxu0 %v1232_v0 }
  0x60   :  { %921 = vmatpush3.msra.mxu0 %v337_v18  ;;  %v574_v18 = vld [vmem:[#allocation9 + $0xc0] sm:$0xff] }
  0x61   :  { %922 = vmatprep.subr.mxu0 %v1232_v0 }
  0x62   :  { %923 = vmatpush3.msra.mxu0 %v336_v19  ;;  %v573_v19 = vld [vmem:[#allocation9 + $0xb8] sm:$0xff] }
  0x63   :  { %924 = vmatprep.subr.mxu0 %v1232_v0 }
  0x64   :  { %925 = vmatpush3.msra.mxu0 %v335_v20  ;;  %v572_v20 = vld [vmem:[#allocation9 + $0xb0] sm:$0xff] }
  0x65   :  { %926 = vmatprep.subr.mxu0 %v1232_v0 }
  0x66   :  { %927 = vmatpush3.msra.mxu0 %v334_v21  ;;  %v571_v21 = vld [vmem:[#allocation9 + $0xa8] sm:$0xff] }
  0x67   :  { %928 = vmatprep.subr.mxu0 %v1232_v0 }
  0x68   :  { %929 = vmatpush3.msra.mxu0 %v333_v22  ;;  %v570_v22 = vld [vmem:[#allocation9 + $0xa0] sm:$0xff] }
  0x69   :  { %930 = vmatprep.subr.mxu0 %v1232_v0 }
  0x6a   :  { %931 = vmatpush3.msra.mxu0 %v332_v23  ;;  %v569_v23 = vld [vmem:[#allocation9 + $0x98] sm:$0xff] }
  0x6b   :  { %932 = vmatprep.subr.mxu0 %v1232_v0 }
  0x6c   :  { %933 = vmatpush3.msra.mxu0 %v331_v24  ;;  %v568_v24 = vld [vmem:[#allocation9 + $0x90] sm:$0xff] }
  0x6d   :  { %934 = vmatprep.subr.mxu0 %v1232_v0 }
  0x6e   :  { %935 = vmatpush3.msra.mxu0 %v330_v25  ;;  %v567_v25 = vld [vmem:[#allocation9 + $0x88] sm:$0xff] }
  0x6f   :  { %936 = vmatprep.subr.mxu0 %v1232_v0 }
  0x70   :  { %937 = vmatpush3.msra.mxu0 %v329_v26 }
  0x71   :  { %976 = vmatprep.subr.mxu0 %v1232_v0 }
 0x110   :  { %v196_v32 = vpop.f32.mrf.mxu0  ;;  %v270_v33 = vpop.f32.mrf.mxu1 }
 0x111   :  { %v271_v34 = vadd.f32 %v270_v33, %v196_v32  ;;  %v454_v32 = vld [vmem:[#allocation10 + $0x60] sm:$0xff]  ;;  %v453_v33 = vld [vmem:[#allocation10 + $0x58] sm:$0xff] }
 0x112   :  { %v198_v37 = vpop.f32.mrf.mxu0  ;;  %v272_v38 = vpop.f32.mrf.mxu1 }
 0x113   :  { %v287_v36 = vadd.f32 %v280_v31, %v271_v34  ;;  %v273_v40 = vadd.f32 %v272_v38, %v198_v37  ;;  %v455_v31 = vld [vmem:[#allocation10 + $0x68] sm:$0xff]  ;;  %v452_v34 = vld [vmem:[#allocation10 + $0x50] sm:$0xff]  ;;  %v449_v37 = vld [vmem:[#allocation10 + $0x38] sm:$0xff] }
 0x114   :  { %946 = vmatpush3.msra.mxu1 %v455_v31  ;;  %v448_v38 = vld [vmem:[#allocation10 + $0x30] sm:$0xff] }
 0x115   :  { %v295_v39 = vand.u32 2147483647, %v287_v36  ;;  %v1339_v44 = vadd.f32 %v284_v41, %v273_v40  ;;  %v289_v57 = vmax.f32 %v287_v36, 0.0  ;;  %vm291_vm3 = vcmp.ne.f32.partialorder %v287_v36, %v287_v36  ;;  %947 = vmatprep.subr.mxu1 %v1232_v0  ;;  %v446_v40 = vld [vmem:[#allocation10 + $0x20] sm:$0xff]  ;;  %v445_v41 = vld [vmem:[#allocation10 + $0x18] sm:$0xff]  ;;  %v687_v31 = vld [vmem:[#allocation10 + $0xb0] sm:$0xff] }
 0x116   :  { %948 = vmatpush3.msra.mxu1 %v454_v32  ;;  %v686_v32 = vld [vmem:[#allocation10 + $0xa8] sm:$0xff] }
 0x117   :  { %v297_v42 = vsub.f32 0.0, %v295_v39  ;;  %v296_v45 = vand.u32 2147483647, %v1339_v44  ;;  %v290_v12 = vmax.f32 %v1339_v44, 0.0  ;;  %vm292_vm5 = vcmp.ne.f32.partialorder %v1339_v44, %v1339_v44  ;;  %949 = vmatprep.subr.mxu1 %v1232_v0  ;;  %v447_v39 = vld [vmem:[#allocation10 + $0x28] sm:$0xff] }
 0x118   :  { %950 = vmatpush3.msra.mxu1 %v453_v33  ;;  %v685_v33 = vld [vmem:[#allocation10 + $0xa0] sm:$0xff] }
 0x119   :  { %v299_v43 = vmul.f32 1.442695, %v297_v42  ;;  %v298_v46 = vsub.f32 0.0, %v296_v45  ;;  %951 = vmatprep.subr.mxu1 %v1232_v0  ;;  %v444_v42 = vld [vmem:[#allocation10 + $0x10] sm:$0xff] }
 0x11a   :  { %952 = vmatpush3.msra.mxu1 %v452_v34  ;;  %v828_v45 = vld [vmem:[%s1435_s6] ss:$0 sm:$0xff]  ;;  %v684_v34 = vld [vmem:[#allocation10 + $0x98] sm:$0xff] }
 0x11b   :  { %1058 = vpow2.f32 %v299_v43  ;;  %v301_v47 = vmul.f32 1.442695, %v298_v46  ;;  %953 = vmatprep.subr.mxu1 %v1232_v0  ;;  %v443_v43 = vld [vmem:[#allocation10 + $0x8] sm:$0xff] }
 0x11c   :  { %954 = vmatpush3.msra.mxu1 %v451_v35  ;;  %v683_v35 = vld [vmem:[#allocation10 + $0x90] sm:$0xff] }
 0x11d   :  { %1060 = vpow2.f32 %v301_v47  ;;  %955 = vmatprep.subr.mxu1 %v1232_v0 }
 0x128   :  { %v1059_v48 = vpop.eup %1058 }
 0x129   :  { %v303_v49 = vadd.f32 1.0, %v1059_v48  ;;  %v306_v50 = vmul.f32 -0.5, %v1059_v48  ;;  %v309_v52 = vand.u32 2147483647, %v1059_v48 }
 0x12a   :  { %v1061_v53 = vpop.eup %1060 }
 0x12b   :  { %1062 = vlog2.f32 %v303_v49  ;;  %v307_v51 = vadd.f32 1.0, %v306_v50  ;;  %vm310_vm2 = vcmp.lt.f32.partialorder %v309_v52, 0.0004427343  ;;  %v312_v58 = vadd.f32 1.0, %v1061_v53 }
 0x12c   :  { %v315_v62 = vmul.f32 -0.5, %v1061_v53  ;;  %v318_v5 = vand.u32 2147483647, %v1061_v53 }
 0x12d   :  { %v308_v56 = vmul.f32 %v1059_v48, %v307_v51  ;;  %1064 = vlog2.f32 %v312_v58 }
 0x12e   :  { %v316_v2 = vadd.f32 1.0, %v315_v62  ;;  %vm319_vm4 = vcmp.lt.f32.partialorder %v318_v5, 0.0004427343 }
 0x130   :  { %v317_v8 = vmul.f32 %v1061_v53, %v316_v2 }
 0x138   :  { %v1063_v54 = vpop.eup %1062 }
 0x139   :  { %v305_v55 = vmul.f32 0.6931472, %v1063_v54  ;;  %v832_v54 = vld [vmem:[%s1435_s6 + $0x1] ss:$0 sm:$0xff] }
 0x13a   :  { %v1065_v63 = vpop.eup %1064 }
 0x13b   :  { %v311_v59 = vsel %vm310_vm2, %v308_v56, %v305_v55  ;;  %v314_v6 = vmul.f32 0.6931472, %v1065_v63 }
 0x13c   :  { %v321_v60 = vadd.f32 %v311_v59, %v289_v57 }
 0x13d   :  { %v320_v10 = vsel %vm319_vm4, %v317_v8, %v314_v6 }
 0x13e   :  { %v323_v61 = vsel %vm291_vm3, %v287_v36, %v321_v60  ;;  %v322_v14 = vadd.f32 %v320_v10, %v290_v12  ;;  %v696_v12 = vld [vmem:[#allocation10 + $0xf8] sm:$0xff] }
 0x13f   :  { %1066 = vtanh.f32 %v323_v61 }
 0x140   :  { %v324_v17 = vsel %vm292_vm5, %v1339_v44, %v322_v14 }
 0x141   :  { %1068 = vtanh.f32 %v324_v17 }
 0x14c   :  { %v1067_v1 = vpop.eup %1066 }
 0x14d   :  { %v327_v3 = vmul.f32 %v1067_v1, %v287_v36  ;;  %v450_v36 = vld [vmem:[#allocation10 + $0x40] sm:$0xff] }
 0x14e   :  { %v1069_v26 = vpop.eup %1068  ;;  %956 = vmatpush3.msra.mxu1 %v450_v36  ;;  %v682_v36 = vld [vmem:[#allocation10 + $0x88] sm:$0xff] }
 0x14f   :  { %939 = vmatmul.mubr.f32.vlgmr.msra.gmra.mxu0 %v327_v3  ;;  %v328_v28 = vmul.f32 %v1069_v26, %v1339_v44  ;;  %957 = vmatprep.subr.mxu1 %v1232_v0  ;;  %v442_v44 = vld [vmem:[#allocation10] sm:$0xff] }
 0x150   :  { %977 = vmatpush3.msra.mxu0 %v581_v4  ;;  %1008 = vmatprep.mubr.msk.f32.mxu0 %vm1233_vm1, %v1232_v0 }
 0x151   :  { %978 = vmatprep.subr.mxu0 %v1232_v0  ;;  %958 = vmatpush3.msra.mxu1 %v449_v37  ;;  %v681_v37 = vld [vmem:[#allocation10 + $0x80] sm:$0xff] }
 0x152   :  { %979 = vmatpush3.msra.mxu0 %v580_v7  ;;  %959 = vmatprep.subr.mxu1 %v1232_v0 }
 0x153   :  { %980 = vmatprep.subr.mxu0 %v1232_v0  ;;  %960 = vmatpush3.msra.mxu1 %v448_v38 }
 0x154   :  { %981 = vmatpush3.msra.mxu0 %v579_v9  ;;  %961 = vmatprep.subr.mxu1 %v1232_v0 }
 0x155   :  { %982 = vmatprep.subr.mxu0 %v1232_v0  ;;  %962 = vmatpush3.msra.mxu1 %v447_v39 }
 0x156   :  { %983 = vmatpush3.msra.mxu0 %v578_v11  ;;  %963 = vmatprep.subr.mxu1 %v1232_v0 }
 0x157   :  { %984 = vmatprep.subr.mxu0 %v1232_v0  ;;  %964 = vmatpush3.msra.mxu1 %v446_v40  ;;  %v829_v40 = vld [vmem:[%s1437_s8] ss:$0 sm:$0xff] }
 0x158   :  { %985 = vmatpush3.msra.mxu0 %v577_v13  ;;  %965 = vmatprep.subr.mxu1 %v1232_v0  ;;  %v695_v13 = vld [vmem:[#allocation10 + $0xf0] sm:$0xff] }
 0x159   :  { %986 = vmatprep.subr.mxu0 %v1232_v0  ;;  %966 = vmatpush3.msra.mxu1 %v445_v41 }
 0x15a   :  { %987 = vmatpush3.msra.mxu0 %v576_v15  ;;  %967 = vmatprep.subr.mxu1 %v1232_v0  ;;  %v694_v15 = vld [vmem:[#allocation10 + $0xe8] sm:$0xff] }
 0x15b   :  { %988 = vmatprep.subr.mxu0 %v1232_v0  ;;  %968 = vmatpush3.msra.mxu1 %v444_v42 }
 0x15c   :  { %989 = vmatpush3.msra.mxu0 %v575_v16  ;;  %969 = vmatprep.subr.mxu1 %v1232_v0  ;;  %v693_v16 = vld [vmem:[#allocation10 + $0xe0] sm:$0xff] }
 0x15d   :  { %990 = vmatprep.subr.mxu0 %v1232_v0  ;;  %970 = vmatpush3.msra.mxu1 %v443_v43 }
 0x15e   :  { %991 = vmatpush3.msra.mxu0 %v574_v18  ;;  %971 = vmatprep.subr.mxu1 %v1232_v0  ;;  %v692_v18 = vld [vmem:[#allocation10 + $0xd8] sm:$0xff] }
 0x15f   :  { %992 = vmatprep.subr.mxu0 %v1232_v0  ;;  %972 = vmatpush3.msra.mxu1 %v442_v44 }
 0x160   :  { %993 = vmatpush3.msra.mxu0 %v573_v19  ;;  %1011 = vmatprep.subr.mxu1 %v1232_v0 }
 0x161   :  { %994 = vmatprep.subr.mxu0 %v1232_v0 }
 0x162   :  { %995 = vmatpush3.msra.mxu0 %v572_v20  ;;  %v691_v20 = vld [vmem:[#allocation10 + $0xd0] sm:$0xff] }
 0x163   :  { %996 = vmatprep.subr.mxu0 %v1232_v0 }
 0x164   :  { %997 = vmatpush3.msra.mxu0 %v571_v21 }
 0x165   :  { %998 = vmatprep.subr.mxu0 %v1232_v0 }
 0x166   :  { %999 = vmatpush3.msra.mxu0 %v570_v22 }
 0x167   :  { %1000 = vmatprep.subr.mxu0 %v1232_v0 }
 0x168   :  { %1001 = vmatpush3.msra.mxu0 %v569_v23 }
 0x169   :  { %1002 = vmatprep.subr.mxu0 %v1232_v0 }
 0x16a   :  { %1003 = vmatpush3.msra.mxu0 %v568_v24  ;;  %v690_v24 = vld [vmem:[#allocation10 + $0xc8] sm:$0xff] }
 0x16b   :  { %1004 = vmatprep.subr.mxu0 %v1232_v0 }
 0x16c   :  { %1005 = vmatpush3.msra.mxu0 %v567_v25 }
 0x16d   :  { %1006 = vmatprep.subr.mxu0 %v1232_v0 }
 0x16e   :  { %1007 = vmatpush3.msra.mxu0 %v566_v27  ;;  %v689_v27 = vld [vmem:[#allocation10 + $0xc0] sm:$0xff] }
 0x16f   :  { %1009 = vmatmul.mubr.f32.vlgmr.msra.gmra.mxu0 %v328_v28 }
 0x20f   :  { %v418_v46 = vpop.f32.mrf.mxu0 }
 0x210   :  { %v419_v47 = vadd.f32 %v828_v45, %v418_v46 }
 0x211   :  { %v940_v48 = vpop.f32.mrf.mxu0 }
 0x212   :  { %v425_v49 = vand.u32 2147483647, %v419_v47  ;;  %v422_v4 = vmax.f32 %v419_v47, 0.0  ;;  %vm423_vm7 = vcmp.ne.f32.partialorder %v419_v47, %v419_v47 }
 0x214   :  { %v426_v50 = vsub.f32 0.0, %v425_v49 }
 0x216   :  { %v427_v51 = vmul.f32 1.442695, %v426_v50 }
 0x218   :  { %1070 = vpow2.f32 %v427_v51 }
 0x225   :  { %v1071_v52 = vpop.eup %1070 }
 0x226   :  { %v429_v53 = vadd.f32 1.0, %v1071_v52  ;;  %v432_v55 = vmul.f32 -0.5, %v1071_v52  ;;  %v435_v61 = vand.u32 2147483647, %v1071_v52 }
 0x228   :  { %1072 = vlog2.f32 %v429_v53  ;;  %v433_v59 = vadd.f32 1.0, %v432_v55  ;;  %vm436_vm6 = vcmp.lt.f32.partialorder %v435_v61, 0.0004427343 }
 0x22a   :  { %v434_v2 = vmul.f32 %v1071_v52, %v433_v59 }
 0x22f   :  { %v656_v56 = vpop.f32.mrf.mxu0 }
 0x230   :  { %v1386_v57 = vadd.f32 %v832_v54, %v656_v56 }
 0x231   :  { %v1010_v58 = vpop.f32.mrf.mxu0 }
 0x232   :  { %v663_v60 = vand.u32 2147483647, %v1386_v57  ;;  %v660_v25 = vmax.f32 %v1386_v57, 0.0  ;;  %vm661_vm9 = vcmp.ne.f32.partialorder %v1386_v57, %v1386_v57 }
 0x234   :  { %v664_v62 = vsub.f32 0.0, %v663_v60 }
 0x235   :  { %v1073_v63 = vpop.eup %1072 }
 0x236   :  { %v431_v1 = vmul.f32 0.6931472, %v1073_v63  ;;  %v665_v3 = vmul.f32 1.442695, %v664_v62 }
 0x238   :  { %v437_v5 = vsel %vm436_vm6, %v434_v2, %v431_v1  ;;  %1074 = vpow2.f32 %v665_v3 }
 0x239   :  { %v438_v6 = vadd.f32 %v437_v5, %v422_v4  ;;  %v830_v5 = vld [vmem:[%s1438_s9] ss:$0 sm:$0xff] }
 0x23b   :  { %v439_v7 = vsel %vm423_vm7, %v419_v47, %v438_v6 }
 0x23c   :  { %1076 = vtanh.f32 %v439_v7 }
 0x245   :  { %v1075_v8 = vpop.eup %1074 }
 0x246   :  { %v667_v9 = vadd.f32 1.0, %v1075_v8  ;;  %v670_v14 = vmul.f32 -0.5, %v1075_v8  ;;  %v673_v19 = vand.u32 2147483647, %v1075_v8 }
 0x248   :  { %1078 = vlog2.f32 %v667_v9  ;;  %v671_v17 = vadd.f32 1.0, %v670_v14  ;;  %vm674_vm8 = vcmp.lt.f32.partialorder %v673_v19, 0.0004427343  ;;  %v836_v19 = vld [vmem:[%s1438_s9 + $0x1] ss:$0 sm:$0xff] }
 0x249   :  { %v1077_v10 = vpop.eup %1076 }
 0x24a   :  { %v441_v11 = vmul.f32 %v1077_v10, %v419_v47  ;;  %v672_v23 = vmul.f32 %v1075_v8, %v671_v17 }
 0x24c   :  { %974 = vmatmul.mubr.f32.vlgmr.msra.gmra.mxu1 %v441_v11 }
 0x24d   :  { %1012 = vmatpush3.msra.mxu1 %v696_v12  ;;  %1043 = vmatprep.mubr.msk.f32.mxu1 %vm1233_vm1, %v1232_v0 }
 0x24e   :  { %1013 = vmatprep.subr.mxu1 %v1232_v0 }
 0x24f   :  { %1014 = vmatpush3.msra.mxu1 %v695_v13 }
 0x250   :  { %1015 = vmatprep.subr.mxu1 %v1232_v0 }
 0x251   :  { %1016 = vmatpush3.msra.mxu1 %v694_v15 }
 0x252   :  { %1017 = vmatprep.subr.mxu1 %v1232_v0 }
 0x253   :  { %1018 = vmatpush3.msra.mxu1 %v693_v16 }
 0x254   :  { %1019 = vmatprep.subr.mxu1 %v1232_v0 }
 0x255   :  { %v1079_v21 = vpop.eup %1078  ;;  %1020 = vmatpush3.msra.mxu1 %v692_v18 }
 0x256   :  { %v669_v22 = vmul.f32 0.6931472, %v1079_v21  ;;  %1021 = vmatprep.subr.mxu1 %v1232_v0 }
 0x257   :  { %1022 = vmatpush3.msra.mxu1 %v691_v20 }
 0x258   :  { %v675_v26 = vsel %vm674_vm8, %v672_v23, %v669_v22  ;;  %1023 = vmatprep.subr.mxu1 %v1232_v0  ;;  %v837_v23 = vld [vmem:[%s1439_s10] ss:$0 sm:$0xff] }
 0x259   :  { %v676_v28 = vadd.f32 %v675_v26, %v660_v25  ;;  %1024 = vmatpush3.msra.mxu1 %v690_v24 }
 0x25a   :  { %1025 = vmatprep.subr.mxu1 %v1232_v0 }
 0x25b   :  { %v677_v30 = vsel %vm661_vm9, %v1386_v57, %v676_v28  ;;  %1026 = vmatpush3.msra.mxu1 %v689_v27 }
 0x25c   :  { %1080 = vtanh.f32 %v677_v30  ;;  %1027 = vmatprep.subr.mxu1 %v1232_v0 }
 0x25d   :  { %1028 = vmatpush3.msra.mxu1 %v688_v29 }
 0x25e   :  { %1029 = vmatprep.subr.mxu1 %v1232_v0 }
 0x25f   :  { %1030 = vmatpush3.msra.mxu1 %v687_v31 }
 0x260   :  { %1031 = vmatprep.subr.mxu1 %v1232_v0 }
 0x261   :  { %1032 = vmatpush3.msra.mxu1 %v686_v32 }
 0x262   :  { %1033 = vmatprep.subr.mxu1 %v1232_v0 }
 0x263   :  { %1034 = vmatpush3.msra.mxu1 %v685_v33 }
 0x264   :  { %1035 = vmatprep.subr.mxu1 %v1232_v0 }
 0x265   :  { %1036 = vmatpush3.msra.mxu1 %v684_v34 }
 0x266   :  { %1037 = vmatprep.subr.mxu1 %v1232_v0 }
 0x267   :  { %1038 = vmatpush3.msra.mxu1 %v683_v35 }
 0x268   :  { %1039 = vmatprep.subr.mxu1 %v1232_v0 }
 0x269   :  { %v1081_v38 = vpop.eup %1080  ;;  %1040 = vmatpush3.msra.mxu1 %v682_v36 }
 0x26a   :  { %1041 = vmatprep.subr.mxu1 %v1232_v0  ;;  %v679_v39 = vmul.f32 %v1081_v38, %v1386_v57  ;;  %v834_v0 = vld [vmem:[%s1437_s8 + $0x1] ss:$0 sm:$0xff] }
 0x26b   :  { %1042 = vmatpush3.msra.mxu1 %v681_v37 }
 0x26c   :  { %1044 = vmatmul.mubr.f32.vlgmr.msra.gmra.mxu1 %v679_v39 }
 0x30c   :  { %v531_v41 = vpop.f32.mrf.mxu1 }
 0x30d   :  { %v532_v42 = vadd.f32 %v829_v40, %v531_v41 }
 0x30e   :  { %v975_v43 = vpop.f32.mrf.mxu1 }
 0x30f   :  { %v538_v44 = vand.u32 2147483647, %v532_v42  ;;  %v535_v61 = vmax.f32 %v532_v42, 0.0  ;;  %vm536_vm11 = vcmp.ne.f32.partialorder %v532_v42, %v532_v42 }
 0x311   :  { %v539_v45 = vsub.f32 0.0, %v538_v44 }
 0x313   :  { %v540_v46 = vmul.f32 1.442695, %v539_v45 }
 0x315   :  { %1082 = vpow2.f32 %v540_v46 }
 0x322   :  { %v1083_v47 = vpop.eup %1082 }
 0x323   :  { %v542_v48 = vadd.f32 1.0, %v1083_v47  ;;  %v545_v49 = vmul.f32 -0.5, %v1083_v47  ;;  %v548_v55 = vand.u32 2147483647, %v1083_v47 }
 0x325   :  { %1084 = vlog2.f32 %v542_v48  ;;  %v546_v53 = vadd.f32 1.0, %v545_v49  ;;  %vm549_vm10 = vcmp.lt.f32.partialorder %v548_v55, 0.0004427343 }
 0x327   :  { %v547_v59 = vmul.f32 %v1083_v47, %v546_v53 }
 0x32c   :  { %v771_v50 = vpop.f32.mrf.mxu1 }
 0x32d   :  { %v772_v51 = vadd.f32 %v834_v0, %v771_v50 }
 0x32e   :  { %v1045_v52 = vpop.f32.mrf.mxu1 }
 0x32f   :  { %v778_v54 = vand.u32 2147483647, %v772_v51  ;;  %v775_v14 = vmax.f32 %v772_v51, 0.0  ;;  %vm776_vm13 = vcmp.ne.f32.partialorder %v772_v51, %v772_v51 }
 0x331   :  { %v779_v56 = vsub.f32 0.0, %v778_v54 }
 0x332   :  { %v1085_v57 = vpop.eup %1084 }
 0x333   :  { %v544_v58 = vmul.f32 0.6931472, %v1085_v57  ;;  %v780_v60 = vmul.f32 1.442695, %v779_v56 }
 0x335   :  { %v550_v62 = vsel %vm549_vm10, %v547_v59, %v544_v58  ;;  %1086 = vpow2.f32 %v780_v60 }
 0x336   :  { %v551_v63 = vadd.f32 %v550_v62, %v535_v61 }
 0x338   :  { %v552_v1 = vsel %vm536_vm11, %v532_v42, %v551_v63 }
 0x339   :  { %1088 = vtanh.f32 %v552_v1 }
 0x342   :  { %v1087_v2 = vpop.eup %1086 }
 0x343   :  { %v782_v3 = vadd.f32 1.0, %v1087_v2  ;;  %v785_v8 = vmul.f32 -0.5, %v1087_v2  ;;  %v788_v10 = vand.u32 2147483647, %v1087_v2 }
 0x345   :  { %1090 = vlog2.f32 %v782_v3  ;;  %v786_v9 = vadd.f32 1.0, %v785_v8  ;;  %vm789_vm12 = vcmp.lt.f32.partialorder %v788_v10, 0.0004427343 }
 0x346   :  { %v1089_v4 = vpop.eup %1088 }
 0x347   :  { %v554_v6 = vmul.f32 %v1089_v4, %v532_v42  ;;  %v787_v13 = vmul.f32 %v1087_v2, %v786_v9 }
 0x349   :  { %v562_v7 = vmul.f32 %v830_v5, %v554_v6 }
 0x34b   :  { %563 = vadd.xlane.f32.xlu0 %v562_v7 }
 0x352   :  { %v1091_v11 = vpop.eup %1090 }
 0x353   :  { %v784_v12 = vmul.f32 0.6931472, %v1091_v11 }
 0x355   :  { %v790_v15 = vsel %vm789_vm12, %v787_v13, %v784_v12 }
 0x356   :  { %v791_v16 = vadd.f32 %v790_v15, %v775_v14 }
 0x358   :  { %v792_v17 = vsel %vm776_vm13, %v772_v51, %v791_v16 }
 0x359   :  { %1092 = vtanh.f32 %v792_v17 }
 0x366   :  { %v1093_v18 = vpop.eup %1092 }
 0x367   :  { %v794_v20 = vmul.f32 %v1093_v18, %v772_v51 }
 0x369   :  { %v803_v21 = vmul.f32 %v836_v19, %v794_v20 }
 0x36b   :  { %804 = vadd.xlane.f32.xlu0 %v803_v21 }
 0x3d4   :  { %v564_v22 = vpop.xlane.xlu0 %563 }
 0x3f4   :  { %v805_v24 = vpop.xlane.xlu0 %804 }
 0x3f5   :  { %v807_v25 = vsel %vm806_vm14, %v564_v22, %v805_v24 }
 0x3f6   :  { %v815_v26 = vadd.f32 %v837_v23, %v807_v25 }
 0x3f8   :  { %817 = vst.msk [vmem:[%s1440_s11] sm:$0xff] %vm816_vm15, %v815_v26 }
 0x3f9   :  { %822 = vsyncpa [#allocation3], 1 }
 0x3fa   :  { %823 = vsyncpa [#allocation5], 1 }
 0x3fb   :  { %824 = vsyncpa [#allocation8], 1 }
 0x3fc   :  { %825 = vsyncpa [#allocation11], 1 }

</bundles_post_ra>
